<compile_context>
chip_gen: v6e
topology: v6e:2x2x1
jax: 0.10.0
libtpu: 0.0.40
codegen_flags: <defaults>
</compile_context>

<pallas_src>
import jax
import jax.numpy as jnp
from jax import lax
from jax.experimental import pallas as pl
from jax.experimental.pallas import tpu as pltpu


def _embed_gather_kernel(ids_ref, emb_hbm, out_ref, sem):
    """Gather tok_block embedding rows from the HBM table via per-row DMA.

    ids_ref : SMEM (N_pad,) int32   -- scalar-prefetched token ids
    emb_hbm : HBM  (V, E)           -- untiled embedding table (pl.ANY)
    out_ref : VMEM (TB, E)          -- pipelined output block (DMA lands here)
    sem     : DMA semaphore shared by all row copies of this block
    """
    i = pl.program_id(0)
    tb = out_ref.shape[0]
    base = i * tb

    def issue(t, carry):
        tok = ids_ref[base + t]                      # scalar read from SMEM
        pltpu.make_async_copy(emb_hbm.at[tok], out_ref.at[t], sem).start()
        return carry

    lax.fori_loop(0, tb, issue, 0)

    def drain(t, carry):
        # Same-shaped descriptor; each wait retires one row's worth of bytes.
        pltpu.make_async_copy(emb_hbm.at[0], out_ref.at[t], sem).wait()
        return carry

    lax.fori_loop(0, tb, drain, 0)


def token_embedding(x, emb_table, *, tok_block=128):
    """x: (B, S) int token ids; emb_table: (V, E) -> (B, S, E)."""
    B, S = x.shape
    V, E = emb_table.shape
    n = B * S

    # Tokens per grid step: multiple of 8 (sublane), capped by the rounded-up
    # token count so tiny inputs don't over-pad.  Tuning knob for large N.
    tb = min(tok_block, pl.cdiv(n, 8) * 8)
    assert tb % 8 == 0

    n_pad = pl.cdiv(n, tb) * tb

    ids = jnp.reshape(x, (n,)).astype(jnp.int32)
    ids = jnp.clip(ids, 0, V - 1)            # guard OOB ids (nn.Embedding would raise)
    ids = jnp.pad(ids, (0, n_pad - n))       # padded tokens gather row 0; sliced off below

    out = pl.pallas_call(
        _embed_gather_kernel,
        out_shape=jax.ShapeDtypeStruct((n_pad, E), emb_table.dtype),
        grid_spec=pltpu.PrefetchScalarGridSpec(
            num_scalar_prefetch=1,                          # ids -> SMEM
            grid=(n_pad // tb,),
            in_specs=[pl.BlockSpec(memory_space=pl.ANY)],   # table stays in HBM
            out_specs=pl.BlockSpec((tb, E), lambda i, ids: (i, 0)),
            scratch_shapes=[
                pltpu.SemaphoreType.DMA,                    # shared row-DMA semaphore
            ],
        ),
        compiler_params=pltpu.CompilerParams(
            dimension_semantics=("parallel",),              # megacore-shardable on v7x
        ),
    )(ids, emb_table)

    return out[:n].reshape(B, S, E)


if __name__ == "__main__":
    key = jax.random.PRNGKey(0)
    k_ids, k_emb = jax.random.split(key)

    vocab_size = 64
    embed_size = 128
    B, S = 2, 8

    # nn.Embedding default init: N(0, 1)
    emb_table = jax.random.normal(k_emb, (vocab_size, embed_size), dtype=jnp.float32)
    x = jax.random.randint(k_ids, (B, S), 0, vocab_size, dtype=jnp.int32)

    out = token_embedding(x, emb_table)
    out = jax.block_until_ready(out)

    # correctness check against the plain-JAX reference of nn.Embedding
    ref = emb_table[x]
    assert out.shape == (B, S, embed_size)
    assert out.dtype == jnp.float32
    assert jnp.allclose(out, ref), "mismatch vs reference gather"

    print("KERNEL_OK")
</pallas_src>

<mosaic_0001>
module attributes {stable_mosaic.version = 11 : i64} {
  func.func @_embed_gather_kernel(%arg0: i32, %arg1: memref<16xi32, #tpu.memory_space<smem>>, %arg2: memref<64x128xf32, #tpu.memory_space<any>>, %arg3: memref<16x128xf32, #tpu.memory_space<vmem>>, %arg4: memref<!tpu.dma_semaphore, #tpu.memory_space<semaphore_mem>>) attributes {dimension_semantics = [#tpu.dimension_semantics<parallel>], iteration_bounds = array<i64: 1>, scalar_prefetch = 1 : i64, scratch_operands = 1 : i64, tpu.core_type = #tpu.core_type<tc>, window_params = [{}, {transform_indices = @transform_1, window_bounds = array<i64: 16, 128>}]} {
    %c16_i32 = arith.constant 16 : i32
    %0 = arith.muli %arg0, %c16_i32 : i32
    %c0_i32 = arith.constant 0 : i32
    %c16_i32_0 = arith.constant 16 : i32
    %1 = arith.addi %c0_i32, %c16_i32_0 : i32
    %c1_i32 = arith.constant 1 : i32
    scf.for %arg5 = %c0_i32 to %1 step %c1_i32  : i32 {
      %3 = arith.addi %0, %arg5 : i32
      %4 = arith.index_cast %3 : i32 to index
      %5 = memref.load %arg1[%4] : memref<16xi32, #tpu.memory_space<smem>>
      %c0_i32_6 = arith.constant 0 : i32
      %6 = tpu.memref_slice %arg2[%5, %c0_i32_6] : memref<64x128xf32, #tpu.memory_space<any>> -> memref<1x128xf32, #tpu.memory_space<any>>
      %7 = tpu.memref_squeeze %6 : memref<1x128xf32, #tpu.memory_space<any>> -> memref<128xf32, #tpu.memory_space<any>>
      %c0_i32_7 = arith.constant 0 : i32
      %8 = tpu.memref_slice %arg3[%arg5, %c0_i32_7] : memref<16x128xf32, #tpu.memory_space<vmem>> -> memref<1x128xf32, #tpu.memory_space<vmem>>
      %9 = tpu.memref_squeeze %8 : memref<1x128xf32, #tpu.memory_space<vmem>> -> memref<128xf32, #tpu.memory_space<vmem>>
      tpu.enqueue_dma source(%7 : memref<128xf32, #tpu.memory_space<any>>) target(%9 : memref<128xf32, #tpu.memory_space<vmem>>) target_semaphore(%arg4 : memref<!tpu.dma_semaphore, #tpu.memory_space<semaphore_mem>>)
    }
    %c16_i32_1 = arith.constant 16 : i32
    %c0_i32_2 = arith.constant 0 : i32
    %c16_i32_3 = arith.constant 16 : i32
    %2 = arith.addi %c0_i32_2, %c16_i32_3 : i32
    %c1_i32_4 = arith.constant 1 : i32
    scf.for %arg5 = %c0_i32_2 to %2 step %c1_i32_4  : i32 {
      %c0_i32_6 = arith.constant 0 : i32
      %c0_i32_7 = arith.constant 0 : i32
      %3 = tpu.memref_slice %arg2[%c0_i32_6, %c0_i32_7] : memref<64x128xf32, #tpu.memory_space<any>> -> memref<1x128xf32, #tpu.memory_space<any>>
      %4 = tpu.memref_squeeze %3 : memref<1x128xf32, #tpu.memory_space<any>> -> memref<128xf32, #tpu.memory_space<any>>
      %c0_i32_8 = arith.constant 0 : i32
      %5 = tpu.memref_slice %arg3[%arg5, %c0_i32_8] : memref<16x128xf32, #tpu.memory_space<vmem>> -> memref<1x128xf32, #tpu.memory_space<vmem>>
      %6 = tpu.memref_squeeze %5 : memref<1x128xf32, #tpu.memory_space<vmem>> -> memref<128xf32, #tpu.memory_space<vmem>>
      tpu.wait_dma2 semaphore(%arg4 : memref<!tpu.dma_semaphore, #tpu.memory_space<semaphore_mem>>) src(%4 : memref<128xf32, #tpu.memory_space<any>>) dst(%6 : memref<128xf32, #tpu.memory_space<vmem>>)
    }
    %c16_i32_5 = arith.constant 16 : i32
    return
  }
  func.func @transform_1(%arg0: i32, %arg1: memref<16xi32, #tpu.memory_space<smem>>) -> (i32, i32) {
    %c0_i32 = arith.constant 0 : i32
    %c0_i32_0 = arith.constant 0 : i32
    return %arg0, %c0_i32 : i32, i32
  }
}

</mosaic_0001>

<bundles_post_ra>
// kernel: tpu_custom_call.1
= control target key start
LH: loop header
LB: loop body
LE: loop exit
PB: predicated region body
PF: predicated region fallthrough
CT: control target
= control target key end

     0   :  { %s172_s9 = smov [#allocation4]   ;;  %s224_s0 = inlined_call_operand.hbm [shape: s32[16], index: 0, kind: input, shape index: {}]   ;;  %s225_s1 = inlined_call_operand.hbm [shape: f32[64,128], index: 1, kind: input, shape index: {}]   ;;  %s226_s2 = inlined_call_operand.hbm [shape: f32[16,128], index: 2, kind: output, shape index: {}]  }
   0x1   :  { %8 = dma.hbm_to_smem %s224_s0, 16, %s172_s9, [#allocation3] }
   0x2   :  { %158 = dma.done.wait [#allocation3], 16 }
   0x3   :  { %159 = vsyncadd [#allocation3], 4294967280 }
   0x4   :  { %10 = sfence }
   0x5   :  { %11 = vsyncpa [#allocation6], 0  ;;  %s194_s12 = smov 0  }
   0x6 LB: > { %s20_s13 = sld [smem:[#allocation4 + %s166_s12]]  ;;  %s23_s14 = scalar_lea.vmem [#allocation5], %s166_s12  ;;  %s166_s12 = sphi %s194_s12, %s18_s12  }
   0x7   : > { %s31_s15 = sshll.u32 %s23_s14, 4  ;;  %s110_s22 = scalar_lea.hbm %s225_s1, 1024  ;;  %s32_s15 = int_to_ptr.vmem [resolvable:$true] %s31_s15 }
   0xc   : > { %s78_s16 = sshll.u32 %s20_s13, 4 }
   0xd   : > { %s22_s18 = scalar_lea.hbm %s225_s1, %s78_s16 }
   0xe   : > { %s108_s19 = scalar_lea.hbm %s22_s18, 16  ;;  %p111_p1 = scmp.lt.s32.totalorder %s22_s18, %s225_s1 }
   0xf   : > { %p109_p0 = scmp.ne.s32.totalorder %s22_s18, %s108_s19  ;;  %p112_p2 = scmp.lt.s32.totalorder %s110_s22, %s108_s19 }
  0x11   : > { %p113_p3 = por %p112_p2, %p111_p1 }
  0x13   : > { %p114_p4 = pnand %p113_p3, %p109_p0 }
  0x15   : > { %117 = shalt.err (!%p114_p4)  }
  0x16   : > { %s118_s25 = scalar_lea.vmem %s32_s15, 16  ;;  %s173_s26 = smov [#allocation5]  }
  0x17   : > { %p119_p5 = scmp.ne.s32.totalorder %s32_s15, %s118_s25  ;;  %s120_s27 = sshll.u32 %s173_s26, 4  ;;  %s210_s27 = int_to_ptr.vmem [resolvable:$false] %s120_s27 }
  0x18   : > { %s122_s28 = scalar_lea.vmem %s210_s27, 256  ;;  %p123_p6 = scmp.lt.s32.totalorder %s32_s15, %s210_s27 }
  0x19   : > { %p124_p7 = scmp.lt.s32.totalorder %s122_s28, %s118_s25 }
  0x1b   : > { %p125_p8 = por %p124_p7, %p123_p6 }
  0x1d   : > { %p126_p9 = pnand %p125_p8, %p119_p5 }
  0x1f   : > { %129 = shalt.err (!%p126_p9)  }
  0x20   : > { %34 = dma.hbm_to_vmem [thread:$0]  %s22_s18, 16, %s32_s15, [#allocation2] }
  0x21   : > { %s18_s12 = sadd.s32 1, %s166_s12  }
  0x22   : > { %p15_p10 = scmp.ge.s32.totalorder %s18_s12, 16  }
  0x23   :  { %s168_s29 = smov (%p15_p10), 0  }
  0x24   :  { %17 = sbr.rel (!%p15_p10) target bundleno = 6 (0x6), region = 40 }
  0x29 LB: > { %160 = dma.done.wait [#allocation2], 16  ;;  %s170_s29 = sphi %s168_s29, %s40_s29  }
  0x2a   : > { %161 = vsyncadd [#allocation2], 4294967280  ;;  %s40_s29 = sadd.s32 1, %s170_s29  }
  0x2b   : > { %p37_p11 = scmp.ge.s32.totalorder %s40_s29, 16  }
  0x2c   :  { %p131_p12 = scmp.ne.s32.totalorder (%p37_p11), %s210_s27, %s122_s28  ;;  %p135_p13 = scmp.lt.s32.totalorder (%p37_p11), %s210_s27, %s210_s27 }
  0x2d   :  { %39 = sbr.rel (!%p37_p11) target bundleno = 41 (0x29), region = 51  ;;  %p136_p0 = scmp.lt.s32.totalorder (%p37_p11), %s122_s28, %s122_s28 }
  0x2f   :  { %p137_p1 = por (%p37_p11), %p136_p0, %p135_p13 }
  0x31   :  { %p138_p2 = pnand (%p37_p11), %p137_p1, %p131_p12 }
  0x33   :  { %141 = shalt.err (!%p138_p2)
}
  0x34   :  { %s174_s30 = smov 128   ;;  %s175_s1 = smov 8  }
  0x35   :  { %54 = dma.vmem_to_hbm [thread:$0]  %s210_s27, 256, %s226_s2, [#allocation6], %s174_s30, %s174_s30, %s175_s1  }
  0x36   :  { %162 = dma.done.wait [#allocation6], 256  }
  0x37   :  { %163 = vsyncadd [#allocation6], 4294967040 }
  0x38   :  { %58 = vsyncpa [#allocation6], 1 }
  0x39   :  { %59 = vsyncmov [#allocation2] }
  0x3c   :  { %s60_s5 = vpop.sfrf %59 }
  0x3d   :  { %p79_p3 = scmp.ne.s32.totalorder %s60_s5, 0 }
  0x3f   :  { %64 = shalt.err (%p79_p3)  }

</bundles_post_ra>
